<compile_context>
chip_gen: v7x
topology: tpu7x:2x2x1
jax: 0.10.0
libtpu: 0.0.40
codegen_flags: <defaults>
</compile_context>

<pallas_src>
import functools

import jax
import jax.numpy as jnp
from jax import lax
from jax.experimental import pallas as pl
from jax.experimental.pallas import tpu as pltpu


def _round_up(x, m):
    return ((x + m - 1) // m) * m


# ---------------------------------------------------------------------------
# Kernel 1: batched input projection for all timesteps (bias folded in).
#   x_ref:(TM, E_pad)  w_ref:(E_pad, 4*H_pad)  b_ref:(1, 4*H_pad)  out_ref:(TM, 4*H_pad)
# ---------------------------------------------------------------------------
def input_proj_kernel(x_ref, w_ref, b_ref, out_ref):
    out_ref[...] = (
        jnp.dot(x_ref[...], w_ref[...], preferred_element_type=jnp.float32)
        + b_ref[...]
    )


# ---------------------------------------------------------------------------
# Kernel 2: LSTM recurrence over time + FC on the final hidden state.
# grid = (batch_tiles, S); h/c carried in VMEM scratch; one MXU dot per step.
#   g_ref:(1, BT, 4*H_pad)   precomputed x_t @ W_ih + b for this (t, batch tile)
#   whh_ref:(H_pad, 4*H_pad) wfc_ref:(H_pad, O_pad) bfc_ref:(1, O_pad)
#   out_ref:(BT, O_pad)      h_ref/c_ref:(BT, H_pad) scratch
# ---------------------------------------------------------------------------
def lstm_step_kernel(g_ref, whh_ref, wfc_ref, bfc_ref, out_ref, h_ref, c_ref):
    t = pl.program_id(1)
    Hp = h_ref.shape[1]

    @pl.when(t == 0)
    def _():
        h_ref[...] = jnp.zeros_like(h_ref)
        c_ref[...] = jnp.zeros_like(c_ref)

    h = h_ref[...]
    c = c_ref[...]

    # Recurrent part only: one (BT, H_pad) @ (H_pad, 4*H_pad) MXU dot per step.
    gates = g_ref[0] + jnp.dot(h, whh_ref[...], preferred_element_type=jnp.float32)

    # PyTorch gate order i, f, g, o; H_pad multiple of 128 -> lane-aligned slices.
    i = jax.nn.sigmoid(gates[:, 0 * Hp:1 * Hp])
    f = jax.nn.sigmoid(gates[:, 1 * Hp:2 * Hp])
    g = jnp.tanh(gates[:, 2 * Hp:3 * Hp])
    o = jax.nn.sigmoid(gates[:, 3 * Hp:4 * Hp])

    c_new = f * c + i * g
    h_new = o * jnp.tanh(c_new)
    h_ref[...] = h_new
    c_ref[...] = c_new

    @pl.when(t == pl.num_programs(1) - 1)
    def _():
        out_ref[...] = (
            jnp.dot(h_new, wfc_ref[...], preferred_element_type=jnp.float32)
            + bfc_ref[...]
        )


# ---------------------------------------------------------------------------
# Parameter init (matches torch layouts: w_ih:(4H,E), w_hh:(4H,H), w_fc:(O,H))
# ---------------------------------------------------------------------------
def init_params(key, vocab_size, embedding_dim, hidden_dim, output_dim):
    ks = jax.random.split(key, 7)
    s = 0.1
    return {
        "embedding": s * jax.random.normal(ks[0], (vocab_size, embedding_dim), jnp.float32),
        "w_ih": s * jax.random.normal(ks[1], (4 * hidden_dim, embedding_dim), jnp.float32),
        "w_hh": s * jax.random.normal(ks[2], (4 * hidden_dim, hidden_dim), jnp.float32),
        "b_ih": s * jax.random.normal(ks[3], (4 * hidden_dim,), jnp.float32),
        "b_hh": s * jax.random.normal(ks[4], (4 * hidden_dim,), jnp.float32),
        "w_fc": s * jax.random.normal(ks[5], (output_dim, hidden_dim), jnp.float32),
        "b_fc": s * jax.random.normal(ks[6], (output_dim,), jnp.float32),
    }


# ---------------------------------------------------------------------------
# Forward: embedding gather (XLA glue) -> proj kernel -> recurrence kernel.
# ---------------------------------------------------------------------------
# TODO(synk): embedding gather stays as XLA glue; a Pallas gather (scalar-prefetch row
#             indices) only pays off once the table no longer fits VMEM.
@functools.partial(jax.jit, static_argnames=())
def sentiment_forward(x_tokens, params):
    B, S = x_tokens.shape
    E = params["embedding"].shape[1]
    H = params["w_hh"].shape[1]
    O = params["w_fc"].shape[0]

    # vreg/MXU friendly padded sizes
    B_pad = _round_up(B, 8)
    E_pad = _round_up(E, 128)
    H_pad = _round_up(H, 128)
    O_pad = _round_up(O, 128)
    G_pad = 4 * H_pad

    # ---- glue: pad table once along E, gather, time-major, pad batch ---------
    emb_table = jnp.pad(params["embedding"].astype(jnp.float32),
                        ((0, 0), (0, E_pad - E)))                   # (V, E_pad)
    emb = jnp.take(emb_table, x_tokens, axis=0)                     # (B, S, E_pad)
    emb = jnp.transpose(emb, (1, 0, 2))                             # (S, B, E_pad)
    emb = jnp.pad(emb, ((0, 0), (0, B_pad - B), (0, 0)))            # (S, B_pad, E_pad)

    # Gate-interleaved padding: each gate occupies its own H_pad lane block.
    def pad_gate_weight(w, in_dim, in_pad):
        w4 = w.reshape(4, H, in_dim)
        w4 = jnp.pad(w4, ((0, 0), (0, H_pad - H), (0, in_pad - in_dim)))
        return jnp.transpose(w4, (2, 0, 1)).reshape(in_pad, G_pad).astype(jnp.float32)

    wih_p = pad_gate_weight(params["w_ih"], E, E_pad)               # (E_pad, G_pad)
    whh_p = pad_gate_weight(params["w_hh"], H, H_pad)               # (H_pad, G_pad)
    b4 = (params["b_ih"] + params["b_hh"]).reshape(4, H)
    b_p = jnp.pad(b4, ((0, 0), (0, H_pad - H))).reshape(1, G_pad).astype(jnp.float32)

    wfc_p = jnp.pad(params["w_fc"].T, ((0, H_pad - H), (0, O_pad - O))).astype(jnp.float32)
    bfc_p = jnp.pad(params["b_fc"], (0, O_pad - O)).reshape(1, O_pad).astype(jnp.float32)

    # ---- phase 1: hoisted input projection for all timesteps -----------------
    rows = S * B_pad                                   # multiple of 8
    ROW_TILE = min(512, rows)                          # rows is a multiple of 8
    rows_pad = _round_up(rows, ROW_TILE)
    emb_flat = emb.reshape(rows, E_pad)
    if rows_pad != rows:
        emb_flat = jnp.pad(emb_flat, ((0, rows_pad - rows), (0, 0)))

    gates_pre_flat = pl.pallas_call(
        input_proj_kernel,
        out_shape=jax.ShapeDtypeStruct((rows_pad, G_pad), jnp.float32),
        grid=(rows_pad // ROW_TILE,),
        in_specs=[
            pl.BlockSpec((ROW_TILE, E_pad), lambda r: (r, 0)),
            pl.BlockSpec((E_pad, G_pad), lambda r: (0, 0)),
            pl.BlockSpec((1, G_pad), lambda r: (0, 0)),
        ],
        out_specs=pl.BlockSpec((ROW_TILE, G_pad), lambda r: (r, 0)),
        compiler_params=pltpu.CompilerParams(dimension_semantics=("parallel",)),
    )(emb_flat, wih_p, b_p)

    gates_pre = gates_pre_flat[:rows].reshape(S, B_pad, G_pad)      # (S, B_pad, G_pad)

    # ---- phase 2: recurrence + FC epilogue ------------------------------------
    # Split the (embarrassingly parallel) batch into 2 tiles when possible so two
    # TensorCores (v7x) / megacore can each run an independent slice of the recurrence.
    if B_pad % 16 == 0:
        B_TILE = B_pad // 2
    else:
        B_TILE = B_pad
    n_btiles = B_pad // B_TILE

    out_pad = pl.pallas_call(
        lstm_step_kernel,
        out_shape=jax.ShapeDtypeStruct((B_pad, O_pad), jnp.float32),
        grid=(n_btiles, S),
        in_specs=[
            pl.BlockSpec((1, B_TILE, G_pad), lambda b, t: (t, b, 0)),
            pl.BlockSpec((H_pad, G_pad), lambda b, t: (0, 0)),
            pl.BlockSpec((H_pad, O_pad), lambda b, t: (0, 0)),
            pl.BlockSpec((1, O_pad), lambda b, t: (0, 0)),
        ],
        out_specs=pl.BlockSpec((B_TILE, O_pad), lambda b, t: (b, 0)),
        scratch_shapes=[
            pltpu.VMEM((B_TILE, H_pad), jnp.float32),   # h
            pltpu.VMEM((B_TILE, H_pad), jnp.float32),   # c
        ],
        compiler_params=pltpu.CompilerParams(
            dimension_semantics=("parallel", "arbitrary")),
    )(gates_pre, whh_p, wfc_p, bfc_p)

    return out_pad[:B, :O]


# ---------------------------------------------------------------------------
# Pure-JAX reference matching torch.nn.LSTM / nn.Linear semantics.
# ---------------------------------------------------------------------------
def sentiment_forward_ref(x_tokens, params):
    embedded = jnp.take(params["embedding"], x_tokens, axis=0)  # (B, S, E)
    B, S, _ = embedded.shape
    H = params["w_hh"].shape[1]
    wih_t = params["w_ih"].T
    whh_t = params["w_hh"].T
    b = params["b_ih"] + params["b_hh"]

    def step(carry, x_t):
        h, c = carry
        gates = x_t @ wih_t + h @ whh_t + b
        i = jax.nn.sigmoid(gates[:, 0 * H:1 * H])
        f = jax.nn.sigmoid(gates[:, 1 * H:2 * H])
        g = jnp.tanh(gates[:, 2 * H:3 * H])
        o = jax.nn.sigmoid(gates[:, 3 * H:4 * H])
        c_new = f * c + i * g
        h_new = o * jnp.tanh(c_new)
        return (h_new, c_new), None

    (h_T, _), _ = lax.scan(
        step,
        (jnp.zeros((B, H), jnp.float32), jnp.zeros((B, H), jnp.float32)),
        jnp.transpose(embedded, (1, 0, 2)),
    )
    return h_T @ params["w_fc"].T + params["b_fc"]


if __name__ == "__main__":
    vocab_size, embedding_dim, hidden_dim, output_dim = 20, 16, 32, 4
    batch, seq = 2, 8

    key = jax.random.PRNGKey(0)
    pkey, xkey = jax.random.split(key)
    params = init_params(pkey, vocab_size, embedding_dim, hidden_dim, output_dim)
    x = jax.random.randint(xkey, (batch, seq), 0, vocab_size, dtype=jnp.int32)

    out = jax.block_until_ready(sentiment_forward(x, params))
    ref = jax.block_until_ready(sentiment_forward_ref(x, params))

    assert out.shape == (batch, output_dim)
    assert jnp.allclose(out, ref, atol=2e-5, rtol=2e-5), "mismatch vs reference"

    print("KERNEL_OK")
</pallas_src>

<mosaic_0001>
module attributes {stable_mosaic.version = 11 : i64} {
  func.func @input_proj_kernel(%arg0: i32, %arg1: memref<64x128xf32, #tpu.memory_space<vmem>>, %arg2: memref<128x512xf32, #tpu.memory_space<vmem>>, %arg3: memref<1x512xf32, #tpu.memory_space<vmem>>, %arg4: memref<64x512xf32, #tpu.memory_space<vmem>>) attributes {dimension_semantics = [#tpu.dimension_semantics<parallel>], iteration_bounds = array<i64: 1>, scalar_prefetch = 0 : i64, scratch_operands = 0 : i64, tpu.core_type = #tpu.core_type<tc>, window_params = [{transform_indices = @transform_0, window_bounds = array<i64: 64, 128>}, {pipeline_mode = #tpu.pipeline_mode<synchronous>, transform_indices = @transform_1, window_bounds = array<i64: 128, 512>}, {pipeline_mode = #tpu.pipeline_mode<synchronous>, transform_indices = @transform_2, window_bounds = array<i64: 1, 512>}, {transform_indices = @transform_3, window_bounds = array<i64: 64, 512>}]} {
    %c0 = arith.constant 0 : index
    %c0_0 = arith.constant 0 : index
    %0 = vector.load %arg1[%c0, %c0_0] : memref<64x128xf32, #tpu.memory_space<vmem>>, vector<64x128xf32>
    %c0_1 = arith.constant 0 : index
    %c0_2 = arith.constant 0 : index
    %1 = vector.load %arg2[%c0_1, %c0_2] : memref<128x512xf32, #tpu.memory_space<vmem>>, vector<128x512xf32>
    %cst = arith.constant dense<0.000000e+00> : vector<64x512xf32>
    %2 = tpu.matmul %0, %1, %cst {dimension_numbers = #tpu.dot_dimension_numbers<[1], [0], [0], [1], [0, 0, 1, 1], [], []>} : vector<64x128xf32>, vector<128x512xf32>, vector<64x512xf32> -> vector<64x512xf32>
    %c0_3 = arith.constant 0 : index
    %c0_4 = arith.constant 0 : index
    %3 = vector.load %arg3[%c0_3, %c0_4] : memref<1x512xf32, #tpu.memory_space<vmem>>, vector<1x512xf32>
    %4 = vector.broadcast %3 : vector<1x512xf32> to vector<64x512xf32>
    %5 = arith.addf %2, %4 : vector<64x512xf32>
    %c0_5 = arith.constant 0 : index
    %c0_6 = arith.constant 0 : index
    %6 = vector.load %arg4[%c0_5, %c0_6] : memref<64x512xf32, #tpu.memory_space<vmem>>, vector<64x512xf32>
    tpu.vector_store %arg4[%c0_5, %c0_6], %5 {strides = array<i32>} : memref<64x512xf32, #tpu.memory_space<vmem>>, vector<64x512xf32>,
    return
  }
  func.func @transform_0(%arg0: i32) -> (i32, i32) {
    %c0_i32 = arith.constant 0 : i32
    %c0_i32_0 = arith.constant 0 : i32
    return %arg0, %c0_i32 : i32, i32
  }
  func.func @transform_1(%arg0: i32) -> (i32, i32) {
    %c0_i32 = arith.constant 0 : i32
    %c0_i32_0 = arith.constant 0 : i32
    %c0_i32_1 = arith.constant 0 : i32
    return %c0_i32, %c0_i32_0 : i32, i32
  }
  func.func @transform_2(%arg0: i32) -> (i32, i32) {
    %c0_i32 = arith.constant 0 : i32
    %c0_i32_0 = arith.constant 0 : i32
    %c0_i32_1 = arith.constant 0 : i32
    return %c0_i32, %c0_i32_0 : i32, i32
  }
  func.func @transform_3(%arg0: i32) -> (i32, i32) {
    %c0_i32 = arith.constant 0 : i32
    %c0_i32_0 = arith.constant 0 : i32
    return %arg0, %c0_i32 : i32, i32
  }
}

module attributes {stable_mosaic.version = 11 : i64} {
  func.func @lstm_step_kernel(%arg0: i32, %arg1: i32, %arg2: memref<1x8x512xf32, #tpu.memory_space<vmem>>, %arg3: memref<128x512xf32, #tpu.memory_space<vmem>>, %arg4: memref<128x128xf32, #tpu.memory_space<vmem>>, %arg5: memref<1x128xf32, #tpu.memory_space<vmem>>, %arg6: memref<8x128xf32, #tpu.memory_space<vmem>>, %arg7: memref<8x128xf32, #tpu.memory_space<vmem>>, %arg8: memref<8x128xf32, #tpu.memory_space<vmem>>) attributes {dimension_semantics = [#tpu.dimension_semantics<parallel>, #tpu.dimension_semantics<arbitrary>], iteration_bounds = array<i64: 1, 8>, scalar_prefetch = 0 : i64, scratch_operands = 2 : i64, tpu.core_type = #tpu.core_type<tc>, window_params = [{transform_indices = @transform_0, window_bounds = array<i64: 1, 8, 512>}, {pipeline_mode = #tpu.pipeline_mode<synchronous>, transform_indices = @transform_1, window_bounds = array<i64: 128, 512>}, {pipeline_mode = #tpu.pipeline_mode<synchronous>, transform_indices = @transform_2, window_bounds = array<i64: 128, 128>}, {pipeline_mode = #tpu.pipeline_mode<synchronous>, transform_indices = @transform_3, window_bounds = array<i64: 1, 128>}, {transform_indices = @transform_4, window_bounds = array<i64: 8, 128>}]} {
    %c0_i32 = arith.constant 0 : i32
    %0 = arith.cmpi eq, %arg1, %c0_i32 : i32
    %1 = arith.extui %0 : i1 to i32
    %c0_i32_0 = arith.constant 0 : i32
    %2 = arith.cmpi ne, %1, %c0_i32_0 : i32
    scf.if %2 {
      %cst_17 = arith.constant 0.000000e+00 : f32
      %40 = vector.broadcast %cst_17 : f32 to vector<8x128xf32>
      %c0_18 = arith.constant 0 : index
      %c0_19 = arith.constant 0 : index
      %41 = vector.load %arg7[%c0_18, %c0_19] : memref<8x128xf32, #tpu.memory_space<vmem>>, vector<8x128xf32>
      tpu.vector_store %arg7[%c0_18, %c0_19], %40 {strides = array<i32>} : memref<8x128xf32, #tpu.memory_space<vmem>>, vector<8x128xf32>,
      %cst_20 = arith.constant 0.000000e+00 : f32
      %42 = vector.broadcast %cst_20 : f32 to vector<8x128xf32>
      %c0_21 = arith.constant 0 : index
      %c0_22 = arith.constant 0 : index
      %43 = vector.load %arg8[%c0_21, %c0_22] : memref<8x128xf32, #tpu.memory_space<vmem>>, vector<8x128xf32>
      tpu.vector_store %arg8[%c0_21, %c0_22], %42 {strides = array<i32>} : memref<8x128xf32, #tpu.memory_space<vmem>>, vector<8x128xf32>,
    } else {
    }
    %c0 = arith.constant 0 : index
    %c0_1 = arith.constant 0 : index
    %3 = vector.load %arg7[%c0, %c0_1] : memref<8x128xf32, #tpu.memory_space<vmem>>, vector<8x128xf32>
    %c0_2 = arith.constant 0 : index
    %c0_3 = arith.constant 0 : index
    %4 = vector.load %arg8[%c0_2, %c0_3] : memref<8x128xf32, #tpu.memory_space<vmem>>, vector<8x128xf32>
    %c0_4 = arith.constant 0 : index
    %c0_5 = arith.constant 0 : index
    %c0_6 = arith.constant 0 : index
    %5 = vector.load %arg2[%c0_4, %c0_5, %c0_6] : memref<1x8x512xf32, #tpu.memory_space<vmem>>, vector<1x8x512xf32>
    %6 = vector.shape_cast %5 : vector<1x8x512xf32> to vector<8x512xf32>
    %c0_7 = arith.constant 0 : index
    %c0_8 = arith.constant 0 : index
    %7 = vector.load %arg3[%c0_7, %c0_8] : memref<128x512xf32, #tpu.memory_space<vmem>>, vector<128x512xf32>
    %cst = arith.constant dense<0.000000e+00> : vector<8x512xf32>
    %8 = tpu.matmul %3, %7, %cst {dimension_numbers = #tpu.dot_dimension_numbers<[1], [0], [0], [1], [0, 0, 1, 1], [], []>} : vector<8x128xf32>, vector<128x512xf32>, vector<8x512xf32> -> vector<8x512xf32>
    %9 = arith.addf %6, %8 : vector<8x512xf32>
    %10 = vector.extract_strided_slice %9 {offsets = [0, 0], sizes = [8, 128], strides = [1, 1]} : vector<8x512xf32> to vector<8x128xf32>
    %11 = arith.negf %10 : vector<8x128xf32>
    %12 = math.exp %11 : vector<8x128xf32>
    %cst_9 = arith.constant 1.000000e+00 : f32
    %13 = vector.broadcast %cst_9 : f32 to vector<8x128xf32>
    %14 = arith.addf %13, %12 : vector<8x128xf32>
    %15 = arith.divf %13, %14 : vector<8x128xf32>
    %16 = vector.extract_strided_slice %9 {offsets = [0, 128], sizes = [8, 128], strides = [1, 1]} : vector<8x512xf32> to vector<8x128xf32>
    %17 = arith.negf %16 : vector<8x128xf32>
    %18 = math.exp %17 : vector<8x128xf32>
    %cst_10 = arith.constant 1.000000e+00 : f32
    %19 = vector.broadcast %cst_10 : f32 to vector<8x128xf32>
    %20 = arith.addf %19, %18 : vector<8x128xf32>
    %21 = arith.divf %19, %20 : vector<8x128xf32>
    %22 = vector.extract_strided_slice %9 {offsets = [0, 256], sizes = [8, 128], strides = [1, 1]} : vector<8x512xf32> to vector<8x128xf32>
    %23 = math.tanh %22 : vector<8x128xf32>
    %24 = vector.extract_strided_slice %9 {offsets = [0, 384], sizes = [8, 128], strides = [1, 1]} : vector<8x512xf32> to vector<8x128xf32>
    %25 = arith.negf %24 : vector<8x128xf32>
    %26 = math.exp %25 : vector<8x128xf32>
    %cst_11 = arith.constant 1.000000e+00 : f32
    %27 = vector.broadcast %cst_11 : f32 to vector<8x128xf32>
    %28 = arith.addf %27, %26 : vector<8x128xf32>
    %29 = arith.divf %27, %28 : vector<8x128xf32>
    %30 = arith.mulf %21, %4 : vector<8x128xf32>
    %31 = arith.mulf %15, %23 : vector<8x128xf32>
    %32 = arith.addf %30, %31 : vector<8x128xf32>
    %33 = math.tanh %32 : vector<8x128xf32>
    %34 = arith.mulf %29, %33 : vector<8x128xf32>
    %c0_12 = arith.constant 0 : index
    %c0_13 = arith.constant 0 : index
    %35 = vector.load %arg7[%c0_12, %c0_13] : memref<8x128xf32, #tpu.memory_space<vmem>>, vector<8x128xf32>
    tpu.vector_store %arg7[%c0_12, %c0_13], %34 {strides = array<i32>} : memref<8x128xf32, #tpu.memory_space<vmem>>, vector<8x128xf32>,
    %c0_14 = arith.constant 0 : index
    %c0_15 = arith.constant 0 : index
    %36 = vector.load %arg8[%c0_14, %c0_15] : memref<8x128xf32, #tpu.memory_space<vmem>>, vector<8x128xf32>
    tpu.vector_store %arg8[%c0_14, %c0_15], %32 {strides = array<i32>} : memref<8x128xf32, #tpu.memory_space<vmem>>, vector<8x128xf32>,
    %c7_i32 = arith.constant 7 : i32
    %37 = arith.cmpi eq, %arg1, %c7_i32 : i32
    %38 = arith.extui %37 : i1 to i32
    %c0_i32_16 = arith.constant 0 : i32
    %39 = arith.cmpi ne, %38, %c0_i32_16 : i32
    scf.if %39 {
      %c0_17 = arith.constant 0 : index
      %c0_18 = arith.constant 0 : index
      %40 = vector.load %arg4[%c0_17, %c0_18] : memref<128x128xf32, #tpu.memory_space<vmem>>, vector<128x128xf32>
      %cst_19 = arith.constant dense<0.000000e+00> : vector<8x128xf32>
      %41 = tpu.matmul %34, %40, %cst_19 {dimension_numbers = #tpu.dot_dimension_numbers<[1], [0], [0], [1], [0, 0, 1, 1], [], []>} : vector<8x128xf32>, vector<128x128xf32>, vector<8x128xf32> -> vector<8x128xf32>
      %c0_20 = arith.constant 0 : index
      %c0_21 = arith.constant 0 : index
      %42 = vector.load %arg5[%c0_20, %c0_21] : memref<1x128xf32, #tpu.memory_space<vmem>>, vector<1x128xf32>
      %43 = vector.broadcast %42 : vector<1x128xf32> to vector<8x128xf32>
      %44 = arith.addf %41, %43 : vector<8x128xf32>
      %c0_22 = arith.constant 0 : index
      %c0_23 = arith.constant 0 : index
      %45 = vector.load %arg6[%c0_22, %c0_23] : memref<8x128xf32, #tpu.memory_space<vmem>>, vector<8x128xf32>
      tpu.vector_store %arg6[%c0_22, %c0_23], %44 {strides = array<i32>} : memref<8x128xf32, #tpu.memory_space<vmem>>, vector<8x128xf32>,
    } else {
    }
    return
  }
  func.func @transform_0(%arg0: i32, %arg1: i32) -> (i32, i32, i32) {
    %c0_i32 = arith.constant 0 : i32
    %c0_i32_0 = arith.constant 0 : i32
    return %arg1, %arg0, %c0_i32 : i32, i32, i32
  }
  func.func @transform_1(%arg0: i32, %arg1: i32) -> (i32, i32) {
    %c0_i32 = arith.constant 0 : i32
    %c0_i32_0 = arith.constant 0 : i32
    %c0_i32_1 = arith.constant 0 : i32
    return %c0_i32, %c0_i32_0 : i32, i32
  }
  func.func @transform_2(%arg0: i32, %arg1: i32) -> (i32, i32) {
    %c0_i32 = arith.constant 0 : i32
    %c0_i32_0 = arith.constant 0 : i32
    %c0_i32_1 = arith.constant 0 : i32
    return %c0_i32, %c0_i32_0 : i32, i32
  }
  func.func @transform_3(%arg0: i32, %arg1: i32) -> (i32, i32) {
    %c0_i32 = arith.constant 0 : i32
    %c0_i32_0 = arith.constant 0 : i32
    %c0_i32_1 = arith.constant 0 : i32
    return %c0_i32, %c0_i32_0 : i32, i32
  }
  func.func @transform_4(%arg0: i32, %arg1: i32) -> (i32, i32) {
    %c0_i32 = arith.constant 0 : i32
    %c0_i32_0 = arith.constant 0 : i32
    return %arg0, %c0_i32 : i32, i32
  }
}

</mosaic_0001>

<bundles_post_ra>
// kernel: sentiment_forward.3
= control target key start
LH: loop header
LB: loop body
LE: loop exit
PB: predicated region body
PF: predicated region fallthrough
CT: control target
= control target key end

     0   :  { %s891_s15 = smov 0   ;;  %s893_s16 = smov 0   ;;  %s1179_s0 = inlined_call_operand.vmem [shape: f32[8,8,512], index: 0, kind: input, shape index: {}]   ;;  %s1180_s1 = inlined_call_operand.vmem [shape: f32[128,512], index: 1, kind: input, shape index: {}]   ;;  %s1181_s2 = inlined_call_operand.vmem [shape: f32[128,128], index: 2, kind: input, shape index: {}]   ;;  %s1182_s3 = inlined_call_operand.vmem [shape: f32[1,128], index: 3, kind: input, shape index: {}]   ;;  %s1183_s4 = inlined_call_operand.vmem [shape: f32[8,128], index: 4, kind: output, shape index: {}]  }
   0x1   :  { %s895_s17 = smov 0  }
   0x2 LB: > { %s23_s18 = sadd.s32 1, %s855_s16  ;;  %p639_p0 = scmp.ge.s32.totalorder %s859_s17, 1  ;;  %s859_s17 = sphi %s895_s17, %s14_s17   ;;  %s855_s16 = sphi %s893_s16, %s1185_s16   ;;  %s851_s15 = sphi %s891_s15, %s1184_s15  }
   0x3   : > { %p24_p1 = scmp.ge.s32.totalorder %s23_s18, 8  ;;  %p180_p2 = scmp.lt.s32.totalorder %s859_s17, 9 }
   0x5   : > { %s1187_s18 = smov (%p24_p1, %s23_s18), 0  ;;  %p181_p3 = pnand %p639_p0, %p180_p2 }
   0x6   : > { %p209_p4 = scmp.lt.s32.totalorder (!%p181_p3), %s851_s15, 7  ;;  %p642_p5 = scmp.ne.s32.totalorder (!%p181_p3), %s851_s15, 0 }
   0x7   : > { %184 = sbr.rel (%p181_p3) target bundleno = 531 (0x213), region = 36 }
   0xe   : > { %s210_s19 = scalar_select %p209_p4, %s851_s15, 7 }
   0xf   : > { %225 = sbr.rel (%p642_p5) target bundleno = 22 (0x16), region = 40  ;;  %v861_v0 = vmov (!%p642_p5), 0.0  }
  0x10   : > { %s651_s20 = sshll.u32 %s210_s19, 5  ;;  %226 = vst [vmem:[#allocation2] sm:$0xff] (!%p642_p5), %v861_v0  ;;  %227 = vst [vmem:[#allocation3] sm:$0xff] (!%p642_p5), %v861_v0 }
  0x11   : > { %s916_s23 = scalar_lea.vmem %s1179_s0, %s651_s20 }
  0x16 PF: > { %v235_v1 = vld [vmem:[%s1180_s1 + $0x8] sm:$0xff]  ;;  %v234_v3 = vld [vmem:[%s1180_s1] sm:$0xff]  ;;  %v862_v8 = vmov 0.0   ;;  %v237_v20 = vld [vmem:[%s1180_s1 + $0x18] sm:$0xff]  ;;  %p646_p6 = scmp.ne.s32.totalorder %s851_s15, 7 }
  0x17   : > { %v239_v2 = vld [vmem:[%s1180_s1 + $0x28] sm:$0xff]  ;;  %v238_v5 = vld [vmem:[%s1180_s1 + $0x20] sm:$0xff]  ;;  %362 = vmatprep.mubr.f32.mxu0 %v862_v8  ;;  %433 = vmatprep.mubr.f32.mxu1 %v862_v8  ;;  %v241_v21 = vld [vmem:[%s1180_s1 + $0x38] sm:$0xff]  ;;  %vm864_vm0 = vmmov (!%p646_p6), 0  }
  0x18   : > { %v704_v4 = vpack.c.bf16 %v239_v2, %v235_v1  ;;  %v243_v6 = vld [vmem:[%s1180_s1 + $0x48] sm:$0xff]  ;;  %v706_v9 = vpack.c.bf16 %v238_v5, %v234_v3  ;;  %v242_v11 = vld [vmem:[%s1180_s1 + $0x40] sm:$0xff]  ;;  %v736_v23 = vpack.c.bf16 %v241_v21, %v237_v20  ;;  %v236_v24 = vld [vmem:[%s1180_s1 + $0x10] sm:$0xff] }
  0x19   : > { %v247_v7 = vld [vmem:[%s1180_s1 + $0x68] sm:$0xff]  ;;  %v246_v12 = vld [vmem:[%s1180_s1 + $0x60] sm:$0xff]  ;;  %v240_v25 = vld [vmem:[%s1180_s1 + $0x30] sm:$0xff] }
  0x1a   : > { %v708_v10 = vpack.c.bf16 %v247_v7, %v243_v6  ;;  %v251_v13 = vld [vmem:[%s1180_s1 + $0x88] sm:$0xff]  ;;  %705 = vmatprep.subr.bf16.mxu0 %v704_v4  ;;  %v710_v15 = vpack.c.bf16 %v246_v12, %v242_v11  ;;  %v250_v16 = vld [vmem:[%s1180_s1 + $0x80] sm:$0xff]  ;;  %v738_v26 = vpack.c.bf16 %v240_v25, %v236_v24  ;;  %737 = vmatprep.subr.bf16.mxu1 %v736_v23  ;;  %v245_v28 = vld [vmem:[%s1180_s1 + $0x58] sm:$0xff] }
  0x1b   : > { %v255_v14 = vld [vmem:[%s1180_s1 + $0xa8] sm:$0xff]  ;;  %707 = vmatpush1.bf16.msra.mxu0 %v706_v9  ;;  %v254_v17 = vld [vmem:[%s1180_s1 + $0xa0] sm:$0xff]  ;;  %v249_v29 = vld [vmem:[%s1180_s1 + $0x78] sm:$0xff] }
  0x1c   : > { %709 = vmatprep.subr.bf16.mxu0 %v708_v10  ;;  %v712_v18 = vpack.c.bf16 %v255_v14, %v251_v13  ;;  %v259_v19 = vld [vmem:[%s1180_s1 + $0xc8] sm:$0xff]  ;;  %v714_v27 = vpack.c.bf16 %v254_v17, %v250_v16  ;;  %v244_v30 = vld [vmem:[%s1180_s1 + $0x50] sm:$0xff]  ;;  %v258_v32 = vld [vmem:[%s1180_s1 + $0xc0] sm:$0xff]  ;;  %739 = vmatpush1.bf16.msra.mxu1 %v738_v26  ;;  %v740_v34 = vpack.c.bf16 %v249_v29, %v245_v28 }
  0x1d   : > { %v263_v22 = vld [vmem:[%s1180_s1 + $0xe8] sm:$0xff]  ;;  %v262_v33 = vld [vmem:[%s1180_s1 + $0xe0] sm:$0xff]  ;;  %v248_v35 = vld [vmem:[%s1180_s1 + $0x70] sm:$0xff] }
  0x1e   : > { %v716_v31 = vpack.c.bf16 %v263_v22, %v259_v19  ;;  %v267_v36 = vld [vmem:[%s1180_s1 + $0x108] sm:$0xff]  ;;  %v742_v38 = vpack.c.bf16 %v248_v35, %v244_v30  ;;  %v253_v39 = vld [vmem:[%s1180_s1 + $0x98] sm:$0xff]  ;;  %741 = vmatprep.subr.bf16.mxu1 %v740_v34  ;;  %v252_v41 = vld [vmem:[%s1180_s1 + $0x90] sm:$0xff]  ;;  %v718_v43 = vpack.c.bf16 %v262_v33, %v258_v32 }
  0x1f   : > { %711 = vmatpush1.bf16.msra.mxu0 %v710_v15  ;;  %v271_v37 = vld [vmem:[%s1180_s1 + $0x128] sm:$0xff]  ;;  %v257_v40 = vld [vmem:[%s1180_s1 + $0xb8] sm:$0xff]  ;;  %v256_v42 = vld [vmem:[%s1180_s1 + $0xb0] sm:$0xff] }
  0x20   : > { %713 = vmatprep.subr.bf16.mxu0 %v712_v18  ;;  %v266_v44 = vld [vmem:[%s1180_s1 + $0x100] sm:$0xff]  ;;  %v744_v46 = vpack.c.bf16 %v257_v40, %v253_v39  ;;  %v720_v47 = vpack.c.bf16 %v271_v37, %v267_v36  ;;  %743 = vmatpush1.bf16.msra.mxu1 %v742_v38  ;;  %v275_v48 = vld [vmem:[%s1180_s1 + $0x148] sm:$0xff]  ;;  %v746_v49 = vpack.c.bf16 %v256_v42, %v252_v41  ;;  %v261_v50 = vld [vmem:[%s1180_s1 + $0xd8] sm:$0xff] }
  0x21   : > { %v270_v45 = vld [vmem:[%s1180_s1 + $0x120] sm:$0xff]  ;;  %v265_v51 = vld [vmem:[%s1180_s1 + $0xf8] sm:$0xff]  ;;  %v279_v52 = vld [vmem:[%s1180_s1 + $0x168] sm:$0xff] }
  0x22   : > { %745 = vmatprep.subr.bf16.mxu1 %v744_v46  ;;  %v748_v53 = vpack.c.bf16 %v265_v51, %v261_v50  ;;  %v260_v54 = vld [vmem:[%s1180_s1 + $0xd0] sm:$0xff]  ;;  %v722_v56 = vpack.c.bf16 %v270_v45, %v266_v44  ;;  %v269_v57 = vld [vmem:[%s1180_s1 + $0x118] sm:$0xff]  ;;  %v724_v59 = vpack.c.bf16 %v279_v52, %v275_v48  ;;  %v274_v60 = vld [vmem:[%s1180_s1 + $0x140] sm:$0xff] }
  0x23   : > { %715 = vmatpush1.bf16.msra.mxu0 %v714_v27  ;;  %v264_v55 = vld [vmem:[%s1180_s1 + $0xf0] sm:$0xff]  ;;  %v273_v58 = vld [vmem:[%s1180_s1 + $0x138] sm:$0xff]  ;;  %v278_v61 = vld [vmem:[%s1180_s1 + $0x160] sm:$0xff] }
  0x24   : > { %717 = vmatprep.subr.bf16.mxu0 %v716_v31  ;;  %747 = vmatpush1.bf16.msra.mxu1 %v746_v49  ;;  %v283_v62 = vld [vmem:[%s1180_s1 + $0x188] sm:$0xff]  ;;  %v750_v63 = vpack.c.bf16 %v264_v55, %v260_v54  ;;  %v752_v1 = vpack.c.bf16 %v273_v58, %v269_v57  ;;  %v268_v2 = vld [vmem:[%s1180_s1 + $0x110] sm:$0xff]  ;;  %v277_v4 = vld [vmem:[%s1180_s1 + $0x158] sm:$0xff]  ;;  %v726_v6 = vpack.c.bf16 %v278_v61, %v274_v60 }
  0x25   : > { %v287_v0 = vld [vmem:[%s1180_s1 + $0x1a8] sm:$0xff]  ;;  %749 = vmatprep.subr.bf16.mxu1 %v748_v53  ;;  %v272_v3 = vld [vmem:[%s1180_s1 + $0x130] sm:$0xff]  ;;  %v281_v5 = vld [vmem:[%s1180_s1 + $0x178] sm:$0xff] }
  0x26   : > { %v728_v7 = vpack.c.bf16 %v287_v0, %v283_v62  ;;  %v282_v8 = vld [vmem:[%s1180_s1 + $0x180] sm:$0xff]  ;;  %v291_v10 = vld [vmem:[%s1180_s1 + $0x1c8] sm:$0xff]  ;;  %v754_v11 = vpack.c.bf16 %v272_v3, %v268_v2  ;;  %v756_v13 = vpack.c.bf16 %v281_v5, %v277_v4  ;;  %v276_v14 = vld [vmem:[%s1180_s1 + $0x150] sm:$0xff]  ;;  %v863_v5 = vmov (!%p646_p6), 0.0|0.0  }
  0x27   : > { %719 = vmatpush1.bf16.msra.mxu0 %v718_v43  ;;  %v286_v9 = vld [vmem:[%s1180_s1 + $0x1a0] sm:$0xff]  ;;  %v295_v12 = vld [vmem:[%s1180_s1 + $0x1e8] sm:$0xff]  ;;  %v280_v15 = vld [vmem:[%s1180_s1 + $0x170] sm:$0xff] }
  0x28   : > { %721 = vmatprep.subr.bf16.mxu0 %v720_v47  ;;  %751 = vmatpush1.bf16.msra.mxu1 %v750_v63  ;;  %v285_v16 = vld [vmem:[%s1180_s1 + $0x198] sm:$0xff]  ;;  %v730_v18 = vpack.c.bf16 %v286_v9, %v282_v8  ;;  %v732_v19 = vpack.c.bf16 %v295_v12, %v291_v10  ;;  %v290_v20 = vld [vmem:[%s1180_s1 + $0x1c0] sm:$0xff]  ;;  %v758_v22 = vpack.c.bf16 %v280_v15, %v276_v14  ;;  %v284_v24 = vld [vmem:[%s1180_s1 + $0x190] sm:$0xff]  ;;  %v865_v8 = vmov (!%p646_p6), 0.0  }
  0x29   : > { %753 = vmatprep.subr.bf16.mxu1 %v752_v1  ;;  %v289_v17 = vld [vmem:[%s1180_s1 + $0x1b8] sm:$0xff]  ;;  %v294_v21 = vld [vmem:[%s1180_s1 + $0x1e0] sm:$0xff]  ;;  %v288_v25 = vld [vmem:[%s1180_s1 + $0x1b0] sm:$0xff] }
  0x2a   : > { %v760_v23 = vpack.c.bf16 %v289_v17, %v285_v16  ;;  %v293_v26 = vld [vmem:[%s1180_s1 + $0x1d8] sm:$0xff]  ;;  %v734_v28 = vpack.c.bf16 %v294_v21, %v290_v20  ;;  %v762_v29 = vpack.c.bf16 %v288_v25, %v284_v24  ;;  %v292_v31 = vld [vmem:[%s1180_s1 + $0x1d0] sm:$0xff]  ;;  %v228_v33 = vld [vmem:[#allocation2] sm:$0xff] }
  0x2b   : > { %723 = vmatpush1.bf16.msra.mxu0 %v722_v56  ;;  %v297_v27 = vld [vmem:[%s1180_s1 + $0x1f8] sm:$0xff]  ;;  %v296_v32 = vld [vmem:[%s1180_s1 + $0x1f0] sm:$0xff]  ;;  %v230_v35 = vld [vmem:[%s916_s23] sm:$0xff] }
  0x2c   : > { %725 = vmatprep.subr.bf16.mxu0 %v724_v59  ;;  %755 = vmatpush1.bf16.msra.mxu1 %v754_v11  ;;  %v764_v30 = vpack.c.bf16 %v297_v27, %v293_v26  ;;  %v766_v34 = vpack.c.bf16 %v296_v32, %v292_v31  ;;  %v231_v36 = vld [vmem:[%s916_s23 + $0x8] sm:$0xff]  ;;  %v233_v43 = vld [vmem:[%s916_s23 + $0x18] sm:$0xff]  ;;  %v232_v47 = vld [vmem:[%s916_s23 + $0x10] sm:$0xff] }
  0x2d   : > { %757 = vmatprep.subr.bf16.mxu1 %v756_v13  ;;  %v229_v56 = vld [vmem:[#allocation3] sm:$0xff]  ;;  %v474_v2 = vld [vmem:[%s1181_s2] sm:$0xff] (!%p646_p6)  ;;  %v476_v4 = vld [vmem:[%s1181_s2 + $0x10] sm:$0xff] (!%p646_p6) }
  0x2e   : > { %v475_v3 = vld [vmem:[%s1181_s2 + $0x8] sm:$0xff] (!%p646_p6)  ;;  %v478_v10 = vld [vmem:[%s1181_s2 + $0x20] sm:$0xff] (!%p646_p6)  ;;  %v480_v13 = vld [vmem:[%s1181_s2 + $0x30] sm:$0xff] (!%p646_p6) }
  0x2f   : > { %727 = vmatpush1.bf16.msra.mxu0 %v726_v6  ;;  %v769_v6 = vpack.c.bf16 (!%p646_p6), %v475_v3, %v474_v2  ;;  %v479_v11 = vld [vmem:[%s1181_s2 + $0x28] sm:$0xff] (!%p646_p6)  ;;  %v481_v14 = vld [vmem:[%s1181_s2 + $0x38] sm:$0xff] (!%p646_p6)  ;;  %v482_v16 = vld [vmem:[%s1181_s2 + $0x40] sm:$0xff] (!%p646_p6) }
  0x30   : > { %729 = vmatprep.subr.bf16.mxu0 %v728_v7  ;;  %759 = vmatpush1.bf16.msra.mxu1 %v758_v22  ;;  %v477_v7 = vld [vmem:[%s1181_s2 + $0x18] sm:$0xff] (!%p646_p6)  ;;  %v775_v12 = vpack.c.bf16 (!%p646_p6), %v479_v11, %v478_v10  ;;  %v778_v15 = vpack.c.bf16 (!%p646_p6), %v481_v14, %v480_v13  ;;  %v483_v17 = vld [vmem:[%s1181_s2 + $0x48] sm:$0xff] (!%p646_p6)  ;;  %v486_v22 = vld [vmem:[%s1181_s2 + $0x60] sm:$0xff] (!%p646_p6) }
  0x31   : > { %761 = vmatprep.subr.bf16.mxu1 %v760_v23  ;;  %v772_v9 = vpack.c.bf16 (!%p646_p6), %v477_v7, %v476_v4  ;;  %v485_v20 = vld [vmem:[%s1181_s2 + $0x58] sm:$0xff] (!%p646_p6)  ;;  %v487_v23 = vld [vmem:[%s1181_s2 + $0x68] sm:$0xff] (!%p646_p6)  ;;  %v488_v25 = vld [vmem:[%s1181_s2 + $0x70] sm:$0xff] (!%p646_p6) }
  0x32   : > { %v787_v24 = vpack.c.bf16 (!%p646_p6), %v487_v23, %v486_v22  ;;  %v489_v26 = vld [vmem:[%s1181_s2 + $0x78] sm:$0xff] (!%p646_p6) }
  0x33   : > { %731 = vmatpush1.bf16.msra.mxu0 %v730_v18  ;;  %v781_v18 = vpack.c.bf16 (!%p646_p6), %v483_v17, %v482_v16  ;;  %v790_v27 = vpack.c.bf16 (!%p646_p6), %v489_v26, %v488_v25 }
  0x34   : > { %733 = vmatprep.subr.bf16.mxu0 %v732_v19  ;;  %763 = vmatpush1.bf16.msra.mxu1 %v762_v29  ;;  %v484_v19 = vld [vmem:[%s1181_s2 + $0x50] sm:$0xff] (!%p646_p6) }
  0x35   : > { %765 = vmatprep.subr.bf16.mxu1 %v764_v30  ;;  %v784_v21 = vpack.c.bf16 (!%p646_p6), %v485_v20, %v484_v19 }
  0x37   : > { %735 = vmatpush1.bf16.msra.mxu0 %v734_v28  ;;  %v647_v28 = vld [vmem:[%s1182_s3] ss:$0 sm:$0xff] (!%p646_p6) }
  0x38   : > { %767 = vmatpush1.bf16.msra.mxu1 %v766_v34  ;;  %768 = vmatprep.subr.bf16.mxu0 (!%p646_p6), %v863_v5 }
  0x3a   : > { %363 = vmatmul.mubr.f32.vlgmr.msra.gmra.mrb[0].mxu0 %v228_v33 }
  0x3b   : > { %434 = vmatmul.mubr.f32.vlgmr.msra.gmra.mrb[0].mxu1 %v228_v33  ;;  %701 = vmatprep.mubr.msk.f32.mxu0 (!%p646_p6), %vm864_vm0, %v865_v8 }
  0x3c   : > { %770 = vmatpush3.bf16.msra.mxu0 (!%p646_p6), %v769_v6 }
  0x3d   : > { %771 = vmatprep.subr.bf16.mxu0 (!%p646_p6), %v863_v5 }
  0x40   : > { %773 = vmatpush3.bf16.msra.mxu0 (!%p646_p6), %v772_v9 }
  0x41   : > { %774 = vmatprep.subr.bf16.mxu0 (!%p646_p6), %v863_v5 }
  0x44   : > { %776 = vmatpush3.bf16.msra.mxu0 (!%p646_p6), %v775_v12 }
  0x45   : > { %777 = vmatprep.subr.bf16.mxu0 (!%p646_p6), %v863_v5 }
  0x48   : > { %779 = vmatpush3.bf16.msra.mxu0 (!%p646_p6), %v778_v15 }
  0x49   : > { %780 = vmatprep.subr.bf16.mxu0 (!%p646_p6), %v863_v5 }
  0x4c   : > { %782 = vmatpush3.bf16.msra.mxu0 (!%p646_p6), %v781_v18 }
  0x4d   : > { %783 = vmatprep.subr.bf16.mxu0 (!%p646_p6), %v863_v5 }
  0x50   : > { %785 = vmatpush3.bf16.msra.mxu0 (!%p646_p6), %v784_v21 }
  0x51   : > { %786 = vmatprep.subr.bf16.mxu0 (!%p646_p6), %v863_v5 }
  0x54   : > { %788 = vmatpush3.bf16.msra.mxu0 (!%p646_p6), %v787_v24 }
  0x55   : > { %789 = vmatprep.subr.bf16.mxu0 (!%p646_p6), %v863_v5 }
  0x58   : > { %791 = vmatpush3.bf16.msra.mxu0 (!%p646_p6), %v790_v27 }
 0x10d   : > { %v364_v37 = vpop.f32.mrb[0].mxu0 }
 0x10e   : > { %v440_v38 = vadd.f32 %v364_v37, %v230_v35  ;;  %v366_v39 = vpop.f32.mrb[1].mxu0  ;;  %v435_v44 = vpop.f32.mrb[0].mxu1 }
 0x10f   : > { %v441_v40 = vadd.f32 %v366_v39, %v231_v36  ;;  %v437_v45 = vpop.f32.mrb[1].mxu1  ;;  %v442_v49 = vadd.f32 %v435_v44, %v232_v47 }
 0x110   : > { %v643_v41 = vmul.f32 -1.442695, %v440_v38  ;;  %v443_v46 = vadd.f32 %v437_v45, %v233_v43 }
 0x111   : > { %v644_v42 = vmul.f32 -1.442695, %v441_v40 }
 0x112   : > { %821 = vpow2.f32 %v643_v41  ;;  %v645_v48 = vmul.f32 -1.442695, %v443_v46 }
 0x113   : > { %823 = vpow2.f32 %v644_v42 }
 0x114   : > { %825 = vpow2.f32 %v645_v48 }
 0x115   : > { %827 = vtanh.f32 %v442_v49 }
 0x11c   : > { %v822_v50 = vpop.eup %821 }
 0x11d   : > { %v824_v51 = vpop.eup %823  ;;  %v447_v52 = vadd.f32 1.0, %v822_v50 }
 0x11e   : > { %v453_v53 = vadd.f32 1.0, %v824_v51  ;;  %v826_v54 = vpop.eup %825 }
 0x11f   : > { %829 = vrcp.f32 %v447_v52  ;;  %v828_v55 = vpop.eup %827  ;;  %v460_v58 = vadd.f32 1.0, %v826_v54 }
 0x120   : > { %831 = vrcp.f32 %v453_v53 }
 0x121   : > { %833 = vrcp.f32 %v460_v58 }
 0x129   : > { %v830_v57 = vpop.eup %829 }
 0x12a   : > { %v832_v59 = vpop.eup %831  ;;  %v464_v60 = vmul.f32 %v830_v57, %v828_v55 }
 0x12b   : > { %v463_v61 = vmul.f32 %v832_v59, %v229_v56  ;;  %v834_v63 = vpop.eup %833 }
 0x12d   : > { %v465_v62 = vadd.f32 %v464_v60, %v463_v61 }
 0x12f   : > { %835 = vtanh.f32 %v465_v62  ;;  %469 = vst [vmem:[#allocation3] sm:$0xff] %v465_v62 }
 0x136   : > { %473 = sbr.rel (%p646_p6) target bundleno = 531 (0x213), region = 44 }
 0x139   : > { %v836_v0 = vpop.eup %835 }
 0x13a   : > { %v467_v1 = vmul.f32 %v836_v0, %v834_v63 }
 0x13c   : > { %468 = vst [vmem:[#allocation2] sm:$0xff] %v467_v1  ;;  %702 = vmatmul.mubr.f32.vlgmr.msra.gmra.mrb[0].mxu0 (!%p646_p6), %v467_v1 }
 0x20f   : > { %v563_v29 = vpop.f32.mrb[0].mxu0 }
 0x210   : > { %v564_v30 = vadd.f32 %v647_v28, %v563_v29  ;;  %v703_v31 = vpop.f32.mrb[1].mxu0 }
 0x212   : > { %567 = vst [vmem:[%s1183_s4] sm:$0xff] %v564_v30 }
 0x213 PF: > { %s14_s17 = sadd.s32 1, %s859_s17   ;;  %s1184_s15 = smov %s855_s16 }
 0x214   : > { %p11_p7 = scmp.ge.s32.totalorder %s14_s17, 10   ;;  %s1185_s16 = smov %s1187_s18 }
 0x216   :  { %13 = sbr.rel (!%p11_p7) target bundleno = 2 (0x2), region = 74 }

// kernel: sentiment_forward.2
= control target key start
LH: loop header
LB: loop body
LE: loop exit
PB: predicated region body
PF: predicated region fallthrough
CT: control target
= control target key end

     0   :  { %v435_v3 = vmov 0.0   ;;  %s827_s1 = inlined_call_operand.vmem [shape: f32[128,512], index: 1, kind: input, shape index: {}]   ;;  %s828_s0 = inlined_call_operand.vmem [shape: f32[64,128], index: 0, kind: input, shape index: {}]   ;;  %s829_s2 = inlined_call_operand.vmem [shape: f32[1,512], index: 2, kind: input, shape index: {}]   ;;  %s830_s3 = inlined_call_operand.vmem [shape: f32[64,512], index: 3, kind: output, shape index: {}]  }
   0x1   :  { %v23_v0 = vld [vmem:[%s827_s1 + $0x8] sm:$0xff]  ;;  %v25_v2 = vld [vmem:[%s827_s1 + $0x18] sm:$0xff]  ;;  %172 = vmatprep.mubr.f32.mxu0 %v435_v3  ;;  %285 = vmatprep.mubr.f32.mxu1 %v435_v3  ;;  %v22_v6 = vld [vmem:[%s827_s1] sm:$0xff] }
   0x2   :  { %v27_v1 = vld [vmem:[%s827_s1 + $0x28] sm:$0xff]  ;;  %v29_v5 = vld [vmem:[%s827_s1 + $0x38] sm:$0xff]  ;;  %v26_v7 = vld [vmem:[%s827_s1 + $0x20] sm:$0xff] }
   0x3   :  { %v370_v4 = vpack.c.bf16 %v27_v1, %v23_v0  ;;  %v402_v8 = vpack.c.bf16 %v29_v5, %v25_v2  ;;  %v372_v9 = vpack.c.bf16 %v26_v7, %v22_v6  ;;  %v24_v10 = vld [vmem:[%s827_s1 + $0x10] sm:$0xff]  ;;  %v31_v12 = vld [vmem:[%s827_s1 + $0x48] sm:$0xff]  ;;  %v33_v15 = vld [vmem:[%s827_s1 + $0x58] sm:$0xff] }
   0x4   :  { %v28_v11 = vld [vmem:[%s827_s1 + $0x30] sm:$0xff]  ;;  %v35_v14 = vld [vmem:[%s827_s1 + $0x68] sm:$0xff]  ;;  %v37_v16 = vld [vmem:[%s827_s1 + $0x78] sm:$0xff] }
   0x5   :  { %371 = vmatprep.subr.bf16.mxu0 %v370_v4  ;;  %v404_v13 = vpack.c.bf16 %v28_v11, %v24_v10  ;;  %403 = vmatprep.subr.bf16.mxu1 %v402_v8  ;;  %v374_v17 = vpack.c.bf16 %v35_v14, %v31_v12  ;;  %v406_v18 = vpack.c.bf16 %v37_v16, %v33_v15  ;;  %v30_v19 = vld [vmem:[%s827_s1 + $0x40] sm:$0xff]  ;;  %v32_v21 = vld [vmem:[%s827_s1 + $0x50] sm:$0xff]  ;;  %v39_v24 = vld [vmem:[%s827_s1 + $0x88] sm:$0xff] }
   0x6   :  { %373 = vmatpush1.bf16.msra.mxu0 %v372_v9  ;;  %v34_v20 = vld [vmem:[%s827_s1 + $0x60] sm:$0xff]  ;;  %v36_v23 = vld [vmem:[%s827_s1 + $0x70] sm:$0xff]  ;;  %v43_v25 = vld [vmem:[%s827_s1 + $0xa8] sm:$0xff] }
   0x7   :  { %405 = vmatpush1.bf16.msra.mxu1 %v404_v13  ;;  %v376_v22 = vpack.c.bf16 %v34_v20, %v30_v19  ;;  %375 = vmatprep.subr.bf16.mxu0 %v374_v17  ;;  %v408_v26 = vpack.c.bf16 %v36_v23, %v32_v21  ;;  %v378_v27 = vpack.c.bf16 %v43_v25, %v39_v24  ;;  %v41_v28 = vld [vmem:[%s827_s1 + $0x98] sm:$0xff]  ;;  %v38_v30 = vld [vmem:[%s827_s1 + $0x80] sm:$0xff]  ;;  %v40_v33 = vld [vmem:[%s827_s1 + $0x90] sm:$0xff] }
   0x8   :  { %407 = vmatprep.subr.bf16.mxu1 %v406_v18  ;;  %v45_v29 = vld [vmem:[%s827_s1 + $0xb8] sm:$0xff]  ;;  %v42_v32 = vld [vmem:[%s827_s1 + $0xa0] sm:$0xff]  ;;  %v44_v34 = vld [vmem:[%s827_s1 + $0xb0] sm:$0xff] }
   0x9   :  { %v410_v31 = vpack.c.bf16 %v45_v29, %v41_v28  ;;  %v380_v35 = vpack.c.bf16 %v42_v32, %v38_v30  ;;  %v47_v36 = vld [vmem:[%s827_s1 + $0xc8] sm:$0xff]  ;;  %v49_v38 = vld [vmem:[%s827_s1 + $0xd8] sm:$0xff]  ;;  %v412_v39 = vpack.c.bf16 %v44_v34, %v40_v33  ;;  %v46_v42 = vld [vmem:[%s827_s1 + $0xc0] sm:$0xff] }
   0xa   :  { %377 = vmatpush1.bf16.msra.mxu0 %v376_v22  ;;  %v51_v37 = vld [vmem:[%s827_s1 + $0xe8] sm:$0xff]  ;;  %v53_v41 = vld [vmem:[%s827_s1 + $0xf8] sm:$0xff]  ;;  %v50_v43 = vld [vmem:[%s827_s1 + $0xe0] sm:$0xff] }
   0xb   :  { %409 = vmatpush1.bf16.msra.mxu1 %v408_v26  ;;  %379 = vmatprep.subr.bf16.mxu0 %v378_v27  ;;  %v382_v40 = vpack.c.bf16 %v51_v37, %v47_v36  ;;  %v414_v44 = vpack.c.bf16 %v53_v41, %v49_v38  ;;  %v48_v45 = vld [vmem:[%s827_s1 + $0xd0] sm:$0xff]  ;;  %v55_v47 = vld [vmem:[%s827_s1 + $0x108] sm:$0xff]  ;;  %v57_v49 = vld [vmem:[%s827_s1 + $0x118] sm:$0xff]  ;;  %v384_v51 = vpack.c.bf16 %v50_v43, %v46_v42  ;;  %v88_v42 = vlaneseq }
   0xc   :  { %411 = vmatprep.subr.bf16.mxu1 %v410_v31  ;;  %v52_v46 = vld [vmem:[%s827_s1 + $0xf0] sm:$0xff]  ;;  %v59_v48 = vld [vmem:[%s827_s1 + $0x128] sm:$0xff]  ;;  %v61_v50 = vld [vmem:[%s827_s1 + $0x138] sm:$0xff] }
   0xd   :  { %v416_v52 = vpack.c.bf16 %v52_v46, %v48_v45  ;;  %v386_v53 = vpack.c.bf16 %v59_v48, %v55_v47  ;;  %v54_v54 = vld [vmem:[%s827_s1 + $0x100] sm:$0xff]  ;;  %v56_v56 = vld [vmem:[%s827_s1 + $0x110] sm:$0xff]  ;;  %v418_v57 = vpack.c.bf16 %v61_v50, %v57_v49  ;;  %v63_v59 = vld [vmem:[%s827_s1 + $0x148] sm:$0xff]  ;;  %v89_v43 = vshrl.u32 %v88_v42, 7 }
   0xe   :  { %381 = vmatpush1.bf16.msra.mxu0 %v380_v35  ;;  %v58_v55 = vld [vmem:[%s827_s1 + $0x120] sm:$0xff]  ;;  %v60_v58 = vld [vmem:[%s827_s1 + $0x130] sm:$0xff]  ;;  %v67_v60 = vld [vmem:[%s827_s1 + $0x168] sm:$0xff] }
   0xf   :  { %413 = vmatpush1.bf16.msra.mxu1 %v412_v39  ;;  %383 = vmatprep.subr.bf16.mxu0 %v382_v40  ;;  %v65_v61 = vld [vmem:[%s827_s1 + $0x158] sm:$0xff]  ;;  %v388_v63 = vpack.c.bf16 %v58_v55, %v54_v54  ;;  %v420_v0 = vpack.c.bf16 %v60_v58, %v56_v56  ;;  %v390_v1 = vpack.c.bf16 %v67_v60, %v63_v59  ;;  %v62_v2 = vld [vmem:[%s827_s1 + $0x140] sm:$0xff]  ;;  %v64_v5 = vld [vmem:[%s827_s1 + $0x150] sm:$0xff]  ;;  %v98_v46 = vsub.s32 2, %v89_v43 }
  0x10   :  { %415 = vmatprep.subr.bf16.mxu1 %v414_v44  ;;  %v69_v62 = vld [vmem:[%s827_s1 + $0x178] sm:$0xff]  ;;  %v66_v4 = vld [vmem:[%s827_s1 + $0x160] sm:$0xff]  ;;  %v68_v7 = vld [vmem:[%s827_s1 + $0x170] sm:$0xff]  ;;  %v90_v44 = vsub.s32 0, %v89_v43  ;;  %v94_v47 = vsub.s32 1, %v89_v43  ;;  %v102_v48 = vsub.s32 3, %v89_v43 }
  0x11   :  { %v422_v6 = vpack.c.bf16 %v69_v62, %v65_v61  ;;  %v71_v8 = vld [vmem:[%s827_s1 + $0x188] sm:$0xff]  ;;  %v73_v10 = vld [vmem:[%s827_s1 + $0x198] sm:$0xff]  ;;  %v392_v12 = vpack.c.bf16 %v66_v4, %v62_v2  ;;  %v424_v13 = vpack.c.bf16 %v68_v7, %v64_v5  ;;  %v70_v15 = vld [vmem:[%s827_s1 + $0x180] sm:$0xff] }
  0x12   :  { %385 = vmatpush1.bf16.msra.mxu0 %v384_v51  ;;  %v75_v9 = vld [vmem:[%s827_s1 + $0x1a8] sm:$0xff]  ;;  %v77_v11 = vld [vmem:[%s827_s1 + $0x1b8] sm:$0xff]  ;;  %v74_v16 = vld [vmem:[%s827_s1 + $0x1a0] sm:$0xff] }
  0x13   :  { %417 = vmatpush1.bf16.msra.mxu1 %v416_v52  ;;  %387 = vmatprep.subr.bf16.mxu0 %v386_v53  ;;  %v394_v14 = vpack.c.bf16 %v75_v9, %v71_v8  ;;  %v72_v17 = vld [vmem:[%s827_s1 + $0x190] sm:$0xff]  ;;  %v426_v18 = vpack.c.bf16 %v77_v11, %v73_v10  ;;  %v79_v20 = vld [vmem:[%s827_s1 + $0x1c8] sm:$0xff]  ;;  %v81_v22 = vld [vmem:[%s827_s1 + $0x1d8] sm:$0xff]  ;;  %v396_v24 = vpack.c.bf16 %v74_v16, %v70_v15 }
  0x14   :  { %419 = vmatprep.subr.bf16.mxu1 %v418_v57  ;;  %v76_v19 = vld [vmem:[%s827_s1 + $0x1b0] sm:$0xff]  ;;  %v83_v21 = vld [vmem:[%s827_s1 + $0x1e8] sm:$0xff]  ;;  %v85_v23 = vld [vmem:[%s827_s1 + $0x1f8] sm:$0xff] }
  0x15   :  { %v428_v25 = vpack.c.bf16 %v76_v19, %v72_v17  ;;  %v398_v26 = vpack.c.bf16 %v83_v21, %v79_v20  ;;  %v78_v27 = vld [vmem:[%s827_s1 + $0x1c0] sm:$0xff]  ;;  %v430_v29 = vpack.c.bf16 %v85_v23, %v81_v22  ;;  %v80_v30 = vld [vmem:[%s827_s1 + $0x1d0] sm:$0xff]  ;;  %v15_v35 = vld [vmem:[%s828_s0 + $0x8] sm:$0xff] }
  0x16   :  { %389 = vmatpush1.bf16.msra.mxu0 %v388_v63  ;;  %v82_v28 = vld [vmem:[%s827_s1 + $0x1e0] sm:$0xff]  ;;  %v84_v31 = vld [vmem:[%s827_s1 + $0x1f0] sm:$0xff]  ;;  %v17_v37 = vld [vmem:[%s828_s0 + $0x18] sm:$0xff] }
  0x17   :  { %421 = vmatpush1.bf16.msra.mxu1 %v420_v0  ;;  %391 = vmatprep.subr.bf16.mxu0 %v390_v1  ;;  %v400_v32 = vpack.c.bf16 %v82_v28, %v78_v27  ;;  %v432_v33 = vpack.c.bf16 %v84_v31, %v80_v30  ;;  %v14_v34 = vld [vmem:[%s828_s0] sm:$0xff]  ;;  %v16_v36 = vld [vmem:[%s828_s0 + $0x10] sm:$0xff]  ;;  %v19_v39 = vld [vmem:[%s828_s0 + $0x28] sm:$0xff] }
  0x18   :  { %423 = vmatprep.subr.bf16.mxu1 %v422_v6  ;;  %v18_v38 = vld [vmem:[%s828_s0 + $0x20] sm:$0xff]  ;;  %v20_v40 = vld [vmem:[%s828_s0 + $0x30] sm:$0xff]  ;;  %v21_v41 = vld [vmem:[%s828_s0 + $0x38] sm:$0xff] }
  0x19   :  { %v86_v45 = vld [vmem:[%s829_s2] sm:$0xf] }
  0x1a   :  { %393 = vmatpush1.bf16.msra.mxu0 %v392_v12  ;;  %v691_v49 = vrot.slane %v86_v45, %v90_v44  ;;  %v693_v50 = vrot.slane %v86_v45, %v98_v46  ;;  %v695_v51 = vrot.slane %v86_v45, %v94_v47  ;;  %v697_v52 = vrot.slane %v86_v45, %v102_v48 }
  0x1b   :  { %425 = vmatpush1.bf16.msra.mxu1 %v424_v13  ;;  %395 = vmatprep.subr.bf16.mxu0 %v394_v14 }
  0x1c   :  { %427 = vmatprep.subr.bf16.mxu1 %v426_v18 }
  0x1e   :  { %397 = vmatpush1.bf16.msra.mxu0 %v396_v24 }
  0x1f   :  { %429 = vmatpush1.bf16.msra.mxu1 %v428_v25  ;;  %399 = vmatprep.subr.bf16.mxu0 %v398_v26 }
  0x20   :  { %431 = vmatprep.subr.bf16.mxu1 %v430_v29 }
  0x22   :  { %401 = vmatpush1.bf16.msra.mxu0 %v400_v32 }
  0x23   :  { %433 = vmatpush1.bf16.msra.mxu1 %v432_v33 }
  0x25   :  { %173 = vmatmul.mubr.f32.vlgmr.msra.gmra.mrb[0].mxu0 %v14_v34 }
  0x26   :  { %286 = vmatmul.mubr.f32.vlgmr.msra.gmra.mrb[0].mxu1 %v14_v34  ;;  %178 = vmatprep.mubr.f32.mxu0 %v435_v3 }
  0x27   :  { %291 = vmatprep.mubr.f32.mxu1 %v435_v3 }
  0x29   :  { %179 = vmatmul.mubr.f32.gmra.mrb[2].mxu0 %v15_v35 }
  0x2a   :  { %292 = vmatmul.mubr.f32.gmra.mrb[2].mxu1 %v15_v35  ;;  %184 = vmatprep.mubr.f32.mxu0 %v435_v3 }
  0x2b   :  { %297 = vmatprep.mubr.f32.mxu1 %v435_v3 }
  0x2d   :  { %185 = vmatmul.mubr.f32.gmra.mrb[4].mxu0 %v16_v36 }
  0x2e   :  { %298 = vmatmul.mubr.f32.gmra.mrb[4].mxu1 %v16_v36  ;;  %190 = vmatprep.mubr.f32.mxu0 %v435_v3 }
  0x2f   :  { %303 = vmatprep.mubr.f32.mxu1 %v435_v3 }
  0x31   :  { %191 = vmatmul.mubr.f32.gmra.mrb[6].mxu0 %v17_v37 }
  0x32   :  { %304 = vmatmul.mubr.f32.gmra.mrb[6].mxu1 %v17_v37  ;;  %196 = vmatprep.mubr.f32.mxu0 %v435_v3 }
  0x33   :  { %309 = vmatprep.mubr.f32.mxu1 %v435_v3 }
  0x35   :  { %197 = vmatmul.mubr.f32.gmra.mrb[8].mxu0 %v18_v38 }
  0x36   :  { %310 = vmatmul.mubr.f32.gmra.mrb[8].mxu1 %v18_v38  ;;  %202 = vmatprep.mubr.f32.mxu0 %v435_v3 }
  0x37   :  { %315 = vmatprep.mubr.f32.mxu1 %v435_v3 }
  0x39   :  { %203 = vmatmul.mubr.f32.gmra.mrb[10].mxu0 %v19_v39 }
  0x3a   :  { %316 = vmatmul.mubr.f32.gmra.mrb[10].mxu1 %v19_v39  ;;  %208 = vmatprep.mubr.f32.mxu0 %v435_v3 }
  0x3b   :  { %321 = vmatprep.mubr.f32.mxu1 %v435_v3 }
  0x3d   :  { %209 = vmatmul.mubr.f32.gmra.mrb[12].mxu0 %v20_v40 }
  0x3e   :  { %322 = vmatmul.mubr.f32.gmra.mrb[12].mxu1 %v20_v40  ;;  %214 = vmatprep.mubr.f32.mxu0 %v435_v3 }
  0x3f   :  { %327 = vmatprep.mubr.f32.mxu1 %v435_v3 }
  0x41   :  { %215 = vmatmul.mubr.f32.gmra.mrb[14].mxu0 %v21_v41 }
  0x42   :  { %328 = vmatmul.mubr.f32.gmra.mrb[14].mxu1 %v21_v41 }
  0xf8   :  { %v174_v3 = vpop.f32.mrb[0].mxu0 }
  0xf9   :  { %v175_v53 = vadd.f32 %v174_v3, %v691_v49  ;;  %v287_v54 = vpop.f32.mrb[0].mxu1  ;;  %v176_v55 = vpop.f32.mrb[1].mxu0 }
  0xfa   :  { %v288_v56 = vadd.f32 %v287_v54, %v693_v50  ;;  %v177_v57 = vadd.f32 %v176_v55, %v695_v51  ;;  %v289_v58 = vpop.f32.mrb[1].mxu1 }
  0xfb   :  { %334 = vst [vmem:[%s830_s3] sm:$0xff] %v175_v53  ;;  %v290_v59 = vadd.f32 %v289_v58, %v697_v52 }
  0xfc   :  { %336 = vst [vmem:[%s830_s3 + $0x10] sm:$0xff] %v288_v56  ;;  %335 = vst [vmem:[%s830_s3 + $0x8] sm:$0xff] %v177_v57  ;;  %v180_v60 = vpop.f32.mrb[2].mxu0 }
  0xfd   :  { %337 = vst [vmem:[%s830_s3 + $0x18] sm:$0xff] %v290_v59  ;;  %v181_v61 = vadd.f32 %v180_v60, %v691_v49  ;;  %v293_v62 = vpop.f32.mrb[2].mxu1  ;;  %v182_v63 = vpop.f32.mrb[3].mxu0 }
  0xfe   :  { %v294_v0 = vadd.f32 %v293_v62, %v693_v50  ;;  %v183_v1 = vadd.f32 %v182_v63, %v695_v51  ;;  %v295_v2 = vpop.f32.mrb[3].mxu1 }
  0xff   :  { %338 = vst [vmem:[%s830_s3 + $0x20] sm:$0xff] %v181_v61  ;;  %v296_v4 = vadd.f32 %v295_v2, %v697_v52 }
 0x100   :  { %340 = vst [vmem:[%s830_s3 + $0x30] sm:$0xff] %v294_v0  ;;  %339 = vst [vmem:[%s830_s3 + $0x28] sm:$0xff] %v183_v1  ;;  %v186_v5 = vpop.f32.mrb[4].mxu0 }
 0x101   :  { %341 = vst [vmem:[%s830_s3 + $0x38] sm:$0xff] %v296_v4  ;;  %v187_v6 = vadd.f32 %v186_v5, %v691_v49  ;;  %v299_v7 = vpop.f32.mrb[4].mxu1  ;;  %v188_v8 = vpop.f32.mrb[5].mxu0 }
 0x102   :  { %v300_v9 = vadd.f32 %v299_v7, %v693_v50  ;;  %v189_v10 = vadd.f32 %v188_v8, %v695_v51  ;;  %v301_v11 = vpop.f32.mrb[5].mxu1 }
 0x103   :  { %342 = vst [vmem:[%s830_s3 + $0x40] sm:$0xff] %v187_v6  ;;  %v302_v12 = vadd.f32 %v301_v11, %v697_v52 }
 0x104   :  { %344 = vst [vmem:[%s830_s3 + $0x50] sm:$0xff] %v300_v9  ;;  %343 = vst [vmem:[%s830_s3 + $0x48] sm:$0xff] %v189_v10  ;;  %v192_v13 = vpop.f32.mrb[6].mxu0 }
 0x105   :  { %345 = vst [vmem:[%s830_s3 + $0x58] sm:$0xff] %v302_v12  ;;  %v193_v14 = vadd.f32 %v192_v13, %v691_v49  ;;  %v305_v15 = vpop.f32.mrb[6].mxu1  ;;  %v194_v16 = vpop.f32.mrb[7].mxu0 }
 0x106   :  { %v306_v17 = vadd.f32 %v305_v15, %v693_v50  ;;  %v195_v18 = vadd.f32 %v194_v16, %v695_v51  ;;  %v307_v19 = vpop.f32.mrb[7].mxu1 }
 0x107   :  { %346 = vst [vmem:[%s830_s3 + $0x60] sm:$0xff] %v193_v14  ;;  %v308_v20 = vadd.f32 %v307_v19, %v697_v52 }
 0x108   :  { %348 = vst [vmem:[%s830_s3 + $0x70] sm:$0xff] %v306_v17  ;;  %347 = vst [vmem:[%s830_s3 + $0x68] sm:$0xff] %v195_v18  ;;  %v198_v21 = vpop.f32.mrb[8].mxu0 }
 0x109   :  { %349 = vst [vmem:[%s830_s3 + $0x78] sm:$0xff] %v308_v20  ;;  %v199_v22 = vadd.f32 %v198_v21, %v691_v49  ;;  %v311_v23 = vpop.f32.mrb[8].mxu1  ;;  %v200_v24 = vpop.f32.mrb[9].mxu0 }
 0x10a   :  { %v312_v25 = vadd.f32 %v311_v23, %v693_v50  ;;  %v201_v26 = vadd.f32 %v200_v24, %v695_v51  ;;  %v313_v27 = vpop.f32.mrb[9].mxu1 }
 0x10b   :  { %350 = vst [vmem:[%s830_s3 + $0x80] sm:$0xff] %v199_v22  ;;  %v314_v28 = vadd.f32 %v313_v27, %v697_v52 }
 0x10c   :  { %352 = vst [vmem:[%s830_s3 + $0x90] sm:$0xff] %v312_v25  ;;  %351 = vst [vmem:[%s830_s3 + $0x88] sm:$0xff] %v201_v26  ;;  %v204_v29 = vpop.f32.mrb[10].mxu0 }
 0x10d   :  { %353 = vst [vmem:[%s830_s3 + $0x98] sm:$0xff] %v314_v28  ;;  %v205_v30 = vadd.f32 %v204_v29, %v691_v49  ;;  %v317_v31 = vpop.f32.mrb[10].mxu1  ;;  %v206_v32 = vpop.f32.mrb[11].mxu0 }
 0x10e   :  { %v318_v33 = vadd.f32 %v317_v31, %v693_v50  ;;  %v207_v34 = vadd.f32 %v206_v32, %v695_v51  ;;  %v319_v35 = vpop.f32.mrb[11].mxu1 }
 0x10f   :  { %354 = vst [vmem:[%s830_s3 + $0xa0] sm:$0xff] %v205_v30  ;;  %v320_v36 = vadd.f32 %v319_v35, %v697_v52 }
 0x110   :  { %356 = vst [vmem:[%s830_s3 + $0xb0] sm:$0xff] %v318_v33  ;;  %355 = vst [vmem:[%s830_s3 + $0xa8] sm:$0xff] %v207_v34  ;;  %v210_v37 = vpop.f32.mrb[12].mxu0 }
 0x111   :  { %357 = vst [vmem:[%s830_s3 + $0xb8] sm:$0xff] %v320_v36  ;;  %v211_v38 = vadd.f32 %v210_v37, %v691_v49  ;;  %v323_v39 = vpop.f32.mrb[12].mxu1  ;;  %v212_v40 = vpop.f32.mrb[13].mxu0 }
 0x112   :  { %v324_v41 = vadd.f32 %v323_v39, %v693_v50  ;;  %v213_v42 = vadd.f32 %v212_v40, %v695_v51  ;;  %v325_v43 = vpop.f32.mrb[13].mxu1 }
 0x113   :  { %358 = vst [vmem:[%s830_s3 + $0xc0] sm:$0xff] %v211_v38  ;;  %v326_v44 = vadd.f32 %v325_v43, %v697_v52 }
 0x114   :  { %360 = vst [vmem:[%s830_s3 + $0xd0] sm:$0xff] %v324_v41  ;;  %359 = vst [vmem:[%s830_s3 + $0xc8] sm:$0xff] %v213_v42  ;;  %v216_v45 = vpop.f32.mrb[14].mxu0 }
 0x115   :  { %361 = vst [vmem:[%s830_s3 + $0xd8] sm:$0xff] %v326_v44  ;;  %v217_v46 = vadd.f32 %v216_v45, %v691_v49  ;;  %v329_v47 = vpop.f32.mrb[14].mxu1  ;;  %v218_v48 = vpop.f32.mrb[15].mxu0 }
 0x116   :  { %v330_v3 = vadd.f32 %v329_v47, %v693_v50  ;;  %v219_v53 = vadd.f32 %v218_v48, %v695_v51  ;;  %v331_v54 = vpop.f32.mrb[15].mxu1 }
 0x117   :  { %362 = vst [vmem:[%s830_s3 + $0xe0] sm:$0xff] %v217_v46  ;;  %v332_v55 = vadd.f32 %v331_v54, %v697_v52 }
 0x118   :  { %364 = vst [vmem:[%s830_s3 + $0xf0] sm:$0xff] %v330_v3  ;;  %363 = vst [vmem:[%s830_s3 + $0xe8] sm:$0xff] %v219_v53 }
 0x119   :  { %365 = vst [vmem:[%s830_s3 + $0xf8] sm:$0xff] %v332_v55 }

</bundles_post_ra>
